<compile_context>
chip_gen: v7x
topology: tpu7x:2x2x1
jax: 0.10.0
libtpu: 0.0.40
codegen_flags: <defaults>
</compile_context>

<pallas_src>
import functools

import jax
import jax.numpy as jnp
from jax.experimental import pallas as pl
from jax.experimental.pallas import tpu as pltpu


# ---------------------------------------------------------------------------
# Generation-aware budgets
# ---------------------------------------------------------------------------
@functools.lru_cache(maxsize=None)
def _tpu_budget():
    """(vmem_limit_bytes, max_row_block) derived from the TPU generation.

    v5e / v6e: 128 MiB physical VMEM -> large activation tiles + high scoped limit.
    v7x: 64 MiB physical VMEM -> conservative tiles so double-buffering survives.
    """
    cap = 0
    try:
        cap = int(getattr(pltpu.get_tpu_info(), "vmem_capacity_bytes", 0))
    except Exception:  # unknown backend / interpret mode -> stay conservative
        cap = 0
    if cap >= 100 * 1024 * 1024:          # v5e / v6e
        return 96 * 1024 * 1024, 1024
    return 44 * 1024 * 1024, 512          # v7x (or unknown)


def _compiler_params(n_axes):
    vmem_limit, _ = _tpu_budget()
    return pltpu.CompilerParams(
        dimension_semantics=("parallel",) * n_axes,
        vmem_limit_bytes=vmem_limit)


# ---------------------------------------------------------------------------
# Pallas kernels
# ---------------------------------------------------------------------------
def _matmul_bn_act_kernel(x_ref, w_ref, scale_ref, shift_ref, o_ref, *, relu):
    """out = act((x @ w) * scale + shift)  -- bf16 MXU matmul, f32 epilogue."""
    y = jnp.dot(x_ref[...], w_ref[...], preferred_element_type=jnp.float32)
    y = y * scale_ref[...] + shift_ref[...]
    if relu:
        y = jnp.maximum(y, 0.0)
    o_ref[...] = y.astype(o_ref.dtype)


def _conv3x3_bn_relu_kernel(x_ref, w_ref, scale_ref, shift_ref, o_ref, *,
                            taps, rb, wo, cin):
    """One (batch, row-band) step of the 3x3 conv.

    x_ref:  (1, P, Hq, Wq, Cin) padded (and, for stride 2, phase-packed) image; resident
            in VMEM across the row-band grid axis (index_map depends only on batch).
    w_ref:  (9*Cin, Cout) tap-stacked weights -> a single deep-K MXU matmul.
    """
    band = pl.program_id(1)
    cout = o_ref.shape[-1]
    # Gather the nine shifted tap windows for this band (row offsets are dynamic along
    # the non-tiled H axis; column shifts are tiny static sublane slices) and stack them
    # along channels: one K = 9*Cin contraction instead of nine shallow K = Cin matmuls.
    cols = []
    for (p, dr, dc) in taps:
        r0 = band * rb + dr
        cols.append(x_ref[0, p, pl.ds(r0, rb), pl.ds(dc, wo), :])
    patches = jnp.concatenate(cols, axis=-1).reshape(rb * wo, 9 * cin)
    y = jnp.dot(patches, w_ref[...], preferred_element_type=jnp.float32)
    y = y * scale_ref[...] + shift_ref[...]
    o_ref[0] = jnp.maximum(y, 0.0).reshape(rb, wo, cout).astype(o_ref.dtype)


def _tail_proj_kernel(x3_ref, w3_ref, s3_ref, b3_ref,
                      xs_ref, ws_ref, ss_ref, bs_ref, o_ref, *, cin):
    """out = relu( bn3(conv3(x3)) + bn_s(conv_s(subsample(x))) )  -- projection shortcut."""
    _, hb, wo, cout = o_ref.shape
    k3 = x3_ref.shape[-1]
    main = jnp.dot(x3_ref[0].reshape(hb * wo, k3), w3_ref[...],
                   preferred_element_type=jnp.float32)
    main = main * s3_ref[...] + b3_ref[...]
    # xs block is (1, hb, 1, wo, s*cin): the BlockSpec DMA selected row-phase 0, the lane
    # slice below selects col-phase 0 -> ::stride subsample without a wrapper gather pass.
    xs = xs_ref[0, :, 0, :, :][:, :, :cin].reshape(hb * wo, cin)
    short = jnp.dot(xs, ws_ref[...], preferred_element_type=jnp.float32)
    short = short * ss_ref[...] + bs_ref[...]
    o_ref[0] = jnp.maximum(main + short, 0.0).reshape(hb, wo, cout).astype(o_ref.dtype)


def _tail_identity_kernel(x3_ref, w3_ref, s3_ref, b3_ref, res_ref, o_ref):
    """out = relu( bn3(conv3(x3)) + residual )  -- identity shortcut, residual on the VPU."""
    _, hb, wo, cout = o_ref.shape
    k3 = x3_ref.shape[-1]
    main = jnp.dot(x3_ref[0].reshape(hb * wo, k3), w3_ref[...],
                   preferred_element_type=jnp.float32)
    main = main * s3_ref[...] + b3_ref[...]
    res = res_ref[0].reshape(hb * wo, cout).astype(jnp.float32)
    o_ref[0] = jnp.maximum(main + res, 0.0).reshape(hb, wo, cout).astype(o_ref.dtype)


# ---------------------------------------------------------------------------
# pallas_call wrappers
# ---------------------------------------------------------------------------
def fused_matmul_bn(x, w, scale, shift, *, relu, out_dtype):
    """x:(M,K) bf16, w:(K,C) bf16, scale/shift:(1,C) f32 -> (M,C)."""
    M, K = x.shape
    _, C = w.shape
    _, max_rows = _tpu_budget()
    bm = M if M <= max_rows else max_rows
    kern = functools.partial(_matmul_bn_act_kernel, relu=relu)
    return pl.pallas_call(
        kern,
        out_shape=jax.ShapeDtypeStruct((M, C), out_dtype),
        grid=(pl.cdiv(M, bm),),
        in_specs=[
            pl.BlockSpec((bm, K), lambda i: (i, 0)),
            pl.BlockSpec((K, C), lambda i: (0, 0)),
            pl.BlockSpec((1, C), lambda i: (0, 0)),
            pl.BlockSpec((1, C), lambda i: (0, 0)),
        ],
        out_specs=pl.BlockSpec((bm, C), lambda i: (i, 0)),
        compiler_params=_compiler_params(1),
    )(x, w, scale, shift)


def _conv3x3_rows_per_band(ho, wo, cout):
    # Keep the (rb*wo, cout) f32 accumulator around vreg capacity (8..32 output rows).
    rb = max(8, 32768 // max(1, wo * cout))
    return max(1, min(ho, 32, rb))


def fused_conv3x3_bn_relu(x_nhwc, w_oihw, bn, stride):
    """3x3 conv (stride 1/2, pad=1, no bias) + folded BN + ReLU.  No HBM im2col:
    each (batch, row-band) grid step builds a small in-VMEM patch matrix and issues one
    MXU matmul with contraction depth K = 9*Cin."""
    assert stride in (1, 2), "ResNet bottleneck only uses stride 1 or 2"
    N, H, W, C = x_nhwc.shape
    Cout = w_oihw.shape[0]
    Ho = (H + 2 - 3) // stride + 1
    Wo = (W + 2 - 3) // stride + 1
    scale, shift = fold_bn(*bn)

    # (Cout, Cin, 3, 3) -> (ky, kx, Cin, Cout) -> (9*Cin, Cout) bf16 for one deep matmul.
    w_im2col = jnp.transpose(w_oihw, (2, 3, 1, 0)).reshape(9 * C, Cout).astype(jnp.bfloat16)

    rb = _conv3x3_rows_per_band(Ho, Wo, Cout)
    nb = pl.cdiv(Ho, rb)

    # TODO(synk): the (1,1) zero-pad (and stride-2 space-to-depth repack) are still
    # wrapper-side HBM passes; folding them into the kernel needs boundary masking.
    if stride == 1:
        Hq = max(H + 2, nb * rb + 2)       # rows needed by the last (partial) band's taps
        Wq = W + 2
        xp = jnp.pad(x_nhwc, ((0, 0), (1, Hq - H - 1), (1, Wq - W - 1), (0, 0)))
        ximg = xp[:, None]                                    # (N, 1, Hq, Wq, C)
        taps = tuple((0, ky, kx) for ky in range(3) for kx in range(3))
    else:
        Hq = max((H + 3) // 2, nb * rb + 1)
        Wq = (W + 3) // 2
        xp = jnp.pad(x_nhwc, ((0, 0), (1, 2 * Hq - H - 1), (1, 2 * Wq - W - 1), (0, 0)))
        # Space-to-depth: phase (h%2, w%2) becomes a leading dim so every stride-2 tap
        # window is a contiguous slice inside the kernel.
        ximg = (xp.reshape(N, Hq, 2, Wq, 2, C)
                  .transpose(0, 2, 4, 1, 3, 5)
                  .reshape(N, 4, Hq, Wq, C))
        taps = tuple((2 * (ky % 2) + (kx % 2), ky // 2, kx // 2)
                     for ky in range(3) for kx in range(3))
    ximg = ximg.astype(jnp.bfloat16)
    P = ximg.shape[1]

    kern = functools.partial(_conv3x3_bn_relu_kernel, taps=taps, rb=rb, wo=Wo, cin=C)
    return pl.pallas_call(
        kern,
        out_shape=jax.ShapeDtypeStruct((N, Ho, Wo, Cout), jnp.bfloat16),
        grid=(N, nb),
        in_specs=[
            # Per-batch padded image: index depends only on n -> stays resident in VMEM
            # across the row-band axis (no re-DMA while bands iterate).
            pl.BlockSpec((1, P, Hq, Wq, C), lambda n, b: (n, 0, 0, 0, 0)),
            pl.BlockSpec((9 * C, Cout), lambda n, b: (0, 0)),
            pl.BlockSpec((1, Cout), lambda n, b: (0, 0)),
            pl.BlockSpec((1, Cout), lambda n, b: (0, 0)),
        ],
        out_specs=pl.BlockSpec((1, rb, Wo, Cout), lambda n, b: (n, b, 0, 0)),
        compiler_params=_compiler_params(2),
    )(ximg, w_im2col, scale, shift)


def _tail_rows_per_band(ho, wo):
    _, max_rows = _tpu_budget()
    return max(1, min(ho, max_rows // max(1, wo)))


def fused_tail_projection(x3, w3, s3, b3, xs, ws, ss, bs, *, cin, out_dtype):
    N, Ho, Wo, K3 = x3.shape
    Cout = w3.shape[1]
    sWC = xs.shape[-1]
    hb = _tail_rows_per_band(Ho, Wo)
    nb = pl.cdiv(Ho, hb)
    kern = functools.partial(_tail_proj_kernel, cin=cin)
    return pl.pallas_call(
        kern,
        out_shape=jax.ShapeDtypeStruct((N, Ho, Wo, Cout), out_dtype),
        grid=(N, nb),
        in_specs=[
            pl.BlockSpec((1, hb, Wo, K3), lambda n, b: (n, b, 0, 0)),
            pl.BlockSpec((K3, Cout), lambda n, b: (0, 0)),
            pl.BlockSpec((1, Cout), lambda n, b: (0, 0)),
            pl.BlockSpec((1, Cout), lambda n, b: (0, 0)),
            # (N, Ho, s, Wo, s*Cin): picking index 0 on the row-phase axis makes the DMA
            # do the row subsample; the col subsample is a lane slice in the kernel.
            pl.BlockSpec((1, hb, 1, Wo, sWC), lambda n, b: (n, b, 0, 0, 0)),
            pl.BlockSpec((cin, Cout), lambda n, b: (0, 0)),
            pl.BlockSpec((1, Cout), lambda n, b: (0, 0)),
            pl.BlockSpec((1, Cout), lambda n, b: (0, 0)),
        ],
        out_specs=pl.BlockSpec((1, hb, Wo, Cout), lambda n, b: (n, b, 0, 0)),
        compiler_params=_compiler_params(2),
    )(x3, w3, s3, b3, xs, ws, ss, bs)


def fused_tail_identity(x3, w3, s3, b3, res, *, out_dtype):
    N, Ho, Wo, K3 = x3.shape
    Cout = w3.shape[1]
    hb = _tail_rows_per_band(Ho, Wo)
    nb = pl.cdiv(Ho, hb)
    return pl.pallas_call(
        _tail_identity_kernel,
        out_shape=jax.ShapeDtypeStruct((N, Ho, Wo, Cout), out_dtype),
        grid=(N, nb),
        in_specs=[
            pl.BlockSpec((1, hb, Wo, K3), lambda n, b: (n, b, 0, 0)),
            pl.BlockSpec((K3, Cout), lambda n, b: (0, 0)),
            pl.BlockSpec((1, Cout), lambda n, b: (0, 0)),
            pl.BlockSpec((1, Cout), lambda n, b: (0, 0)),
            pl.BlockSpec((1, hb, Wo, Cout), lambda n, b: (n, b, 0, 0)),
        ],
        out_specs=pl.BlockSpec((1, hb, Wo, Cout), lambda n, b: (n, b, 0, 0)),
        compiler_params=_compiler_params(2),
    )(x3, w3, s3, b3, res)


# ---------------------------------------------------------------------------
# BN folding (eval semantics)
# ---------------------------------------------------------------------------
def fold_bn(gamma, beta, mean, var, eps=1e-5):
    scale = (gamma / jnp.sqrt(var + eps)).astype(jnp.float32)
    shift = (beta - mean * scale).astype(jnp.float32)
    return scale.reshape(1, -1), shift.reshape(1, -1)


# ---------------------------------------------------------------------------
# Bottleneck forward (Pallas)
# ---------------------------------------------------------------------------
def bottleneck_forward(x_nchw, params, in_planes, planes, stride, out_dtype=jnp.bfloat16):
    expansion = 4
    out_planes = expansion * planes
    N, Cin, H, W = x_nchw.shape
    assert Cin == in_planes

    # TODO(synk): NCHW<->NHWC conversion kept to honor the PyTorch Conv2d interface; an
    # NHWC end-to-end network would drop this extra HBM pass.
    x = jnp.transpose(x_nchw, (0, 2, 3, 1)).astype(jnp.bfloat16)

    # ---- conv1 (1x1) + bn1 + relu -----------------------------------------
    w1 = params["conv1_w"].reshape(planes, in_planes).T.astype(jnp.bfloat16)
    s1, b1 = fold_bn(*params["bn1"])
    out1 = fused_matmul_bn(x.reshape(N * H * W, in_planes), w1, s1, b1,
                           relu=True, out_dtype=jnp.bfloat16).reshape(N, H, W, planes)
    # TODO(synk): fusing conv1 per row band into the 3x3 kernel (out1 band never written
    # to HBM) is the next large mem-bound win; needs in-kernel zero-pad masking.

    # ---- conv2 (3x3, stride, pad=1) + bn2 + relu ---------------------------
    out2 = fused_conv3x3_bn_relu(out1, params["conv2_w"], params["bn2"], stride)
    _, Ho, Wo, _ = out2.shape

    # ---- conv3 (1x1) + bn3, shortcut, add, relu ----------------------------
    w3 = params["conv3_w"].reshape(out_planes, planes).T.astype(jnp.bfloat16)
    s3, b3 = fold_bn(*params["bn3"])
    if (stride != 1) or (in_planes != out_planes):
        ws = params["sc_conv_w"].reshape(out_planes, in_planes).T.astype(jnp.bfloat16)
        ss, bs = fold_bn(*params["sc_bn"])
        if H % stride == 0 and W % stride == 0:
            # Free reshape; the tail kernel's BlockSpec DMA + a lane slice do the
            # ::stride subsample (no wrapper-side strided-gather HBM pass).
            xs = x.reshape(N, Ho, stride, Wo, stride * in_planes)
        else:
            # TODO(synk): odd spatial extents fall back to an XLA strided gather.
            xs = x[:, ::stride, ::stride, :].reshape(N, Ho, 1, Wo, in_planes)
        out = fused_tail_projection(out2, w3, s3, b3, xs, ws, ss, bs,
                                    cin=in_planes, out_dtype=out_dtype)
    else:
        # Identity shortcut: raw bf16 residual added on the VPU (no eye-matmul).
        out = fused_tail_identity(out2, w3, s3, b3, x, out_dtype=out_dtype)
    return jnp.transpose(out, (0, 3, 1, 2))               # NHWC -> NCHW


# ---------------------------------------------------------------------------
# Pure-JAX f32 reference (correctness oracle)
# ---------------------------------------------------------------------------
def _ref_conv(x_nhwc, w_oihw, stride, padding):
    return jax.lax.conv_general_dilated(
        x_nhwc, jnp.transpose(w_oihw, (2, 3, 1, 0)),
        window_strides=(stride, stride), padding=padding,
        dimension_numbers=("NHWC", "HWIO", "NHWC"))


def _ref_bn(x, bn, eps=1e-5):
    gamma, beta, mean, var = bn
    return (x - mean) / jnp.sqrt(var + eps) * gamma + beta


def bottleneck_reference(x_nchw, params, in_planes, planes, stride):
    expansion = 4
    out_planes = expansion * planes
    x = jnp.transpose(x_nchw, (0, 2, 3, 1))
    o = jax.nn.relu(_ref_bn(_ref_conv(x, params["conv1_w"], 1, "VALID"), params["bn1"]))
    o = jax.nn.relu(_ref_bn(_ref_conv(o, params["conv2_w"], stride, [(1, 1), (1, 1)]), params["bn2"]))
    o = _ref_bn(_ref_conv(o, params["conv3_w"], 1, "VALID"), params["bn3"])
    if stride != 1 or in_planes != out_planes:
        sc = _ref_bn(_ref_conv(x, params["sc_conv_w"], stride, "VALID"), params["sc_bn"])
    else:
        sc = x
    out = jax.nn.relu(o + sc)
    return jnp.transpose(out, (0, 3, 1, 2))


# ---------------------------------------------------------------------------
def make_params(key, in_planes, planes, stride):
    expansion = 4
    out_planes = expansion * planes
    keys = jax.random.split(key, 8)

    def bn_params(k, c):
        k1, k2, k3, k4 = jax.random.split(k, 4)
        gamma = 1.0 + 0.1 * jax.random.normal(k1, (c,), jnp.float32)
        beta = 0.1 * jax.random.normal(k2, (c,), jnp.float32)
        mean = 0.1 * jax.random.normal(k3, (c,), jnp.float32)
        var = 1.0 + 0.1 * jax.random.uniform(k4, (c,), jnp.float32)
        return (gamma, beta, mean, var)

    p = {
        "conv1_w": 0.2 * jax.random.normal(keys[0], (planes, in_planes, 1, 1), jnp.float32),
        "bn1": bn_params(keys[1], planes),
        "conv2_w": 0.2 * jax.random.normal(keys[2], (planes, planes, 3, 3), jnp.float32),
        "bn2": bn_params(keys[3], planes),
        "conv3_w": 0.2 * jax.random.normal(keys[4], (out_planes, planes, 1, 1), jnp.float32),
        "bn3": bn_params(keys[5], out_planes),
    }
    if stride != 1 or in_planes != out_planes:
        p["sc_conv_w"] = 0.2 * jax.random.normal(keys[6], (out_planes, in_planes, 1, 1), jnp.float32)
        p["sc_bn"] = bn_params(keys[7], out_planes)
    return p


if __name__ == "__main__":
    key = jax.random.PRNGKey(0)
    configs = [
        # (in_planes, planes, stride, N, H, W)
        (8, 4, 2, 2, 16, 16),    # projection shortcut + stride-2 (phase-packed) 3x3 path
        (16, 4, 1, 2, 40, 16),   # identity shortcut + stride-1 path, multi-band + partial tiles
    ]
    for in_planes, planes, stride, N, H, W in configs:
        key, kx, kp = jax.random.split(key, 3)
        x = jax.random.normal(kx, (N, in_planes, H, W), jnp.float32)   # NCHW, like PyTorch
        params = make_params(kp, in_planes, planes, stride)

        out = jax.block_until_ready(
            bottleneck_forward(x, params, in_planes, planes, stride))
        ref = jax.block_until_ready(
            bottleneck_reference(x, params, in_planes, planes, stride))

        Ho = (H + 2 - 3) // stride + 1
        Wo = (W + 2 - 3) // stride + 1
        assert out.shape == (N, 4 * planes, Ho, Wo), out.shape
        # Loose tolerance: kernel runs bf16 MXU matmuls + bf16 output vs. f32 XLA reference.
        out_f32 = out.astype(jnp.float32)
        max_err = float(jnp.max(jnp.abs(out_f32 - ref)))
        assert jnp.allclose(out_f32, ref, rtol=1e-1, atol=1e-1), max_err
    print("KERNEL_OK")
</pallas_src>

<mosaic_0001>
module attributes {stable_mosaic.version = 11 : i64} {
  func.func @_matmul_bn_act_kernel(%arg0: i32, %arg1: memref<512x8xbf16, #tpu.memory_space<vmem>>, %arg2: memref<8x4xbf16, #tpu.memory_space<vmem>>, %arg3: memref<1x4xf32, #tpu.memory_space<vmem>>, %arg4: memref<1x4xf32, #tpu.memory_space<vmem>>, %arg5: memref<512x4xbf16, #tpu.memory_space<vmem>>) attributes {dimension_semantics = [#tpu.dimension_semantics<parallel>], iteration_bounds = array<i64: 1>, scalar_prefetch = 0 : i64, scratch_operands = 0 : i64, tpu.core_type = #tpu.core_type<tc>, window_params = [{transform_indices = @transform_0, window_bounds = array<i64: 512, 8>}, {pipeline_mode = #tpu.pipeline_mode<synchronous>, transform_indices = @transform_1, window_bounds = array<i64: 8, 4>}, {pipeline_mode = #tpu.pipeline_mode<synchronous>, transform_indices = @transform_2, window_bounds = array<i64: 1, 4>}, {pipeline_mode = #tpu.pipeline_mode<synchronous>, transform_indices = @transform_3, window_bounds = array<i64: 1, 4>}, {transform_indices = @transform_4, window_bounds = array<i64: 512, 4>}]} {
    %c0 = arith.constant 0 : index
    %c0_0 = arith.constant 0 : index
    %0 = vector.load %arg1[%c0, %c0_0] : memref<512x8xbf16, #tpu.memory_space<vmem>>, vector<512x8xbf16>
    %c0_1 = arith.constant 0 : index
    %c0_2 = arith.constant 0 : index
    %1 = vector.load %arg2[%c0_1, %c0_2] : memref<8x4xbf16, #tpu.memory_space<vmem>>, vector<8x4xbf16>
    %cst = arith.constant dense<0.000000e+00> : vector<512x4xf32>
    %2 = tpu.matmul %0, %1, %cst {dimension_numbers = #tpu.dot_dimension_numbers<[1], [0], [0], [1], [0, 0, 1, 1], [], []>} : vector<512x8xbf16>, vector<8x4xbf16>, vector<512x4xf32> -> vector<512x4xf32>
    %c0_3 = arith.constant 0 : index
    %c0_4 = arith.constant 0 : index
    %3 = vector.load %arg3[%c0_3, %c0_4] : memref<1x4xf32, #tpu.memory_space<vmem>>, vector<1x4xf32>
    %4 = vector.broadcast %3 : vector<1x4xf32> to vector<512x4xf32>
    %5 = arith.mulf %2, %4 : vector<512x4xf32>
    %c0_5 = arith.constant 0 : index
    %c0_6 = arith.constant 0 : index
    %6 = vector.load %arg4[%c0_5, %c0_6] : memref<1x4xf32, #tpu.memory_space<vmem>>, vector<1x4xf32>
    %7 = vector.broadcast %6 : vector<1x4xf32> to vector<512x4xf32>
    %8 = arith.addf %5, %7 : vector<512x4xf32>
    %cst_7 = arith.constant 0.000000e+00 : f32
    %9 = vector.broadcast %cst_7 : f32 to vector<512x4xf32>
    %10 = arith.maximumf %8, %9 : vector<512x4xf32>
    %11 = arith.truncf %10 : vector<512x4xf32> to vector<512x4xbf16>
    %c0_8 = arith.constant 0 : index
    %c0_9 = arith.constant 0 : index
    %12 = vector.load %arg5[%c0_8, %c0_9] : memref<512x4xbf16, #tpu.memory_space<vmem>>, vector<512x4xbf16>
    tpu.vector_store %arg5[%c0_8, %c0_9], %11 {strides = array<i32>} : memref<512x4xbf16, #tpu.memory_space<vmem>>, vector<512x4xbf16>,
    return
  }
  func.func @transform_0(%arg0: i32) -> (i32, i32) {
    %c0_i32 = arith.constant 0 : i32
    %c0_i32_0 = arith.constant 0 : i32
    return %arg0, %c0_i32 : i32, i32
  }
  func.func @transform_1(%arg0: i32) -> (i32, i32) {
    %c0_i32 = arith.constant 0 : i32
    %c0_i32_0 = arith.constant 0 : i32
    %c0_i32_1 = arith.constant 0 : i32
    return %c0_i32, %c0_i32_0 : i32, i32
  }
  func.func @transform_2(%arg0: i32) -> (i32, i32) {
    %c0_i32 = arith.constant 0 : i32
    %c0_i32_0 = arith.constant 0 : i32
    %c0_i32_1 = arith.constant 0 : i32
    return %c0_i32, %c0_i32_0 : i32, i32
  }
  func.func @transform_3(%arg0: i32) -> (i32, i32) {
    %c0_i32 = arith.constant 0 : i32
    %c0_i32_0 = arith.constant 0 : i32
    %c0_i32_1 = arith.constant 0 : i32
    return %c0_i32, %c0_i32_0 : i32, i32
  }
  func.func @transform_4(%arg0: i32) -> (i32, i32) {
    %c0_i32 = arith.constant 0 : i32
    %c0_i32_0 = arith.constant 0 : i32
    return %arg0, %c0_i32 : i32, i32
  }
}

</mosaic_0001>

<bundles_post_ra>
// kernel: tpu_custom_call.1
= control target key start
LH: loop header
LB: loop body
LE: loop exit
PB: predicated region body
PF: predicated region fallthrough
CT: control target
= control target key end

     0   :  { %vm340_vm0 = vcmask 1043456   ;;  %vm243_vm1 = vcmask 64512   ;;  %vm1095_vm2 = vcmask 27648   ;;  %s2043_s1 = inlined_call_operand.vmem [shape: bf16[8,4], index: 1, kind: input, shape index: {}]   ;;  %s2044_s0 = inlined_call_operand.vmem [shape: bf16[512,8], index: 0, kind: input, shape index: {}]   ;;  %s2045_s2 = inlined_call_operand.vmem [shape: f32[1,4], index: 2, kind: input, shape index: {}]   ;;  %s2046_s3 = inlined_call_operand.vmem [shape: f32[1,4], index: 3, kind: input, shape index: {}]   ;;  %s2047_s4 = inlined_call_operand.vmem [shape: bf16[512,4], index: 4, kind: output, shape index: {}]  }
   0x1   :  { %v82_v0 = vld [vmem:[%s2043_s1] sm:$0xf]  ;;  %v1463_v4 = vld [vmem:[%s2044_s0 + $0x8] sm:$0xff]   ;;  %v1465_v6 = vld [vmem:[%s2044_s0 + $0x10] sm:$0xff]  }
   0x2   :  { %1459 = vmatprep.subr.msk.bf16.mxu0 %vm340_vm0, %v82_v0  ;;  %1460 = vmatprep.subr.msk.bf16.mxu1 %vm340_vm0, %v82_v0  ;;  %v342_v1 = vsel %vm340_vm0, %v82_v0, 0  ;;  %v1461_v2 = vld [vmem:[%s2044_s0] sm:$0xff]   ;;  %v1464_v5 = vld [vmem:[%s2044_s0 + $0x88] sm:$0xff]   ;;  %v1466_v7 = vld [vmem:[%s2044_s0 + $0x90] sm:$0xff]  }
   0x3   :  { %1392 = vmatpush3.bf16.msra.mxu0 %v342_v1  ;;  %1458 = vmatpush3.bf16.msra.mxu1 %v342_v1  ;;  %v1462_v3 = vld [vmem:[%s2044_s0 + $0x80] sm:$0xff]   ;;  %v1467_v8 = vld [vmem:[%s2044_s0 + $0x18] sm:$0xff]   ;;  %v1471_v12 = vld [vmem:[%s2044_s0 + $0x28] sm:$0xff]  }
   0x4   :  { %1393 = vmatprep.mubr.msk.bf16.mxu0 %vm243_vm1, %v1461_v2  ;;  %1425 = vmatprep.mubr.msk.bf16.mxu1 %vm243_vm1, %v1462_v3  ;;  %v1468_v9 = vld [vmem:[%s2044_s0 + $0x98] sm:$0xff]   ;;  %v1469_v10 = vld [vmem:[%s2044_s0 + $0x20] sm:$0xff]   ;;  %v1472_v13 = vld [vmem:[%s2044_s0 + $0xa8] sm:$0xff]  }
   0x5   :  { %v1470_v11 = vld [vmem:[%s2044_s0 + $0xa0] sm:$0xff]   ;;  %v1473_v14 = vld [vmem:[%s2044_s0 + $0x30] sm:$0xff]   ;;  %v1475_v16 = vld [vmem:[%s2044_s0 + $0x38] sm:$0xff]  }
   0x6   :  { %1394 = vmatmul.mubr.msk.bf16.vlgmr.msra.gmra.mrb[0].mxu0 %vm243_vm1, %v1463_v4  ;;  %1426 = vmatmul.mubr.msk.bf16.vlgmr.msra.gmra.mrb[0].mxu1 %vm243_vm1, %v1464_v5  ;;  %v1474_v15 = vld [vmem:[%s2044_s0 + $0xb0] sm:$0xff]   ;;  %v1476_v17 = vld [vmem:[%s2044_s0 + $0xb8] sm:$0xff]   ;;  %v1477_v18 = vld [vmem:[%s2044_s0 + $0x40] sm:$0xff]  }
   0x7   :  { %1397 = vmatprep.mubr.msk.bf16.mxu0 %vm243_vm1, %v1465_v6  ;;  %1429 = vmatprep.mubr.msk.bf16.mxu1 %vm243_vm1, %v1466_v7  ;;  %v1478_v19 = vld [vmem:[%s2044_s0 + $0xc0] sm:$0xff]   ;;  %v1479_v20 = vld [vmem:[%s2044_s0 + $0x48] sm:$0xff]   ;;  %v1481_v22 = vld [vmem:[%s2044_s0 + $0x50] sm:$0xff]  }
   0x8   :  { %v1480_v21 = vld [vmem:[%s2044_s0 + $0xc8] sm:$0xff]   ;;  %v1482_v23 = vld [vmem:[%s2044_s0 + $0xd0] sm:$0xff]   ;;  %v1483_v24 = vld [vmem:[%s2044_s0 + $0x58] sm:$0xff]  }
   0x9   :  { %v1484_v25 = vld [vmem:[%s2044_s0 + $0xd8] sm:$0xff]   ;;  %v1485_v26 = vld [vmem:[%s2044_s0 + $0x60] sm:$0xff]   ;;  %v1487_v28 = vld [vmem:[%s2044_s0 + $0x68] sm:$0xff]  }
   0xa   :  { %v1486_v27 = vld [vmem:[%s2044_s0 + $0xe0] sm:$0xff]   ;;  %v1488_v29 = vld [vmem:[%s2044_s0 + $0xe8] sm:$0xff]   ;;  %v1489_v30 = vld [vmem:[%s2044_s0 + $0x70] sm:$0xff]  }
   0xb   :  { %v1490_v31 = vld [vmem:[%s2044_s0 + $0xf0] sm:$0xff]   ;;  %v1491_v32 = vld [vmem:[%s2044_s0 + $0x78] sm:$0xff]   ;;  %v1652_v34 = vld [vmem:[%s2045_s2] ss:$0 sm:$0xff] }
   0xc   :  { %v1492_v33 = vld [vmem:[%s2044_s0 + $0xf8] sm:$0xff]   ;;  %v1657_v36 = vld [vmem:[%s2046_s3] ss:$0 sm:$0xff] }
   0xe   :  { %1398 = vmatmul.mubr.msk.bf16.gmra.mrb[4].mxu0 %vm243_vm1, %v1467_v8  ;;  %1430 = vmatmul.mubr.msk.bf16.gmra.mrb[4].mxu1 %vm243_vm1, %v1468_v9 }
   0xf   :  { %1401 = vmatprep.mubr.msk.bf16.mxu0 %vm243_vm1, %v1469_v10  ;;  %1433 = vmatprep.mubr.msk.bf16.mxu1 %vm243_vm1, %v1470_v11 }
  0x16   :  { %1402 = vmatmul.mubr.msk.bf16.gmra.mrb[8].mxu0 %vm243_vm1, %v1471_v12  ;;  %1434 = vmatmul.mubr.msk.bf16.gmra.mrb[8].mxu1 %vm243_vm1, %v1472_v13 }
  0x17   :  { %1405 = vmatprep.mubr.msk.bf16.mxu0 %vm243_vm1, %v1473_v14  ;;  %1437 = vmatprep.mubr.msk.bf16.mxu1 %vm243_vm1, %v1474_v15 }
  0x1e   :  { %1406 = vmatmul.mubr.msk.bf16.gmra.mrb[12].mxu0 %vm243_vm1, %v1475_v16  ;;  %1438 = vmatmul.mubr.msk.bf16.gmra.mrb[12].mxu1 %vm243_vm1, %v1476_v17 }
  0x1f   :  { %1409 = vmatprep.mubr.msk.bf16.mxu0 %vm243_vm1, %v1477_v18  ;;  %1441 = vmatprep.mubr.msk.bf16.mxu1 %vm243_vm1, %v1478_v19 }
  0x26   :  { %1410 = vmatmul.mubr.msk.bf16.gmra.mrb[16].mxu0 %vm243_vm1, %v1479_v20  ;;  %1442 = vmatmul.mubr.msk.bf16.gmra.mrb[16].mxu1 %vm243_vm1, %v1480_v21 }
  0x27   :  { %1413 = vmatprep.mubr.msk.bf16.mxu0 %vm243_vm1, %v1481_v22  ;;  %1445 = vmatprep.mubr.msk.bf16.mxu1 %vm243_vm1, %v1482_v23 }
  0x2e   :  { %1414 = vmatmul.mubr.msk.bf16.gmra.mrb[20].mxu0 %vm243_vm1, %v1483_v24  ;;  %1446 = vmatmul.mubr.msk.bf16.gmra.mrb[20].mxu1 %vm243_vm1, %v1484_v25 }
  0x2f   :  { %1417 = vmatprep.mubr.msk.bf16.mxu0 %vm243_vm1, %v1485_v26  ;;  %1449 = vmatprep.mubr.msk.bf16.mxu1 %vm243_vm1, %v1486_v27 }
  0x36   :  { %1418 = vmatmul.mubr.msk.bf16.gmra.mrb[24].mxu0 %vm243_vm1, %v1487_v28  ;;  %1450 = vmatmul.mubr.msk.bf16.gmra.mrb[24].mxu1 %vm243_vm1, %v1488_v29 }
  0x37   :  { %1421 = vmatprep.mubr.msk.bf16.mxu0 %vm243_vm1, %v1489_v30  ;;  %1453 = vmatprep.mubr.msk.bf16.mxu1 %vm243_vm1, %v1490_v31 }
  0x3e   :  { %1422 = vmatmul.mubr.msk.bf16.gmra.mrb[28].mxu0 %vm243_vm1, %v1491_v32  ;;  %1454 = vmatmul.mubr.msk.bf16.gmra.mrb[28].mxu1 %vm243_vm1, %v1492_v33 }
  0xd9   :  { %v1395_v35 = vpop.f32.mrb[0].mxu0  ;;  %v1427_v38 = vpop.f32.mrb[0].mxu1 }
  0xda   :  { %v642_v37 = vmul.f32 %v1395_v35, %v1652_v34  ;;  %v378_v39 = vpop.f32.mrb[1].mxu0  ;;  %v674_v40 = vmul.f32 %v1427_v38, %v1652_v34  ;;  %v506_v42 = vpop.f32.mrb[1].mxu1 }
  0xdb   :  { %v640_v41 = vmul.f32 %v1652_v34, %v378_v39  ;;  %v1396_v43 = vpop.f32.mrb[2].mxu0  ;;  %v672_v45 = vmul.f32 %v1652_v34, %v506_v42  ;;  %v1428_v47 = vpop.f32.mrb[2].mxu1 }
  0xdc   :  { %v713_v44 = vadd.f32 %v1657_v36, %v642_v37  ;;  %v643_v46 = vmul.f32 %v1396_v43, %v1652_v34  ;;  %v381_v48 = vpop.f32.mrb[3].mxu0  ;;  %v745_v49 = vadd.f32 %v1657_v36, %v674_v40  ;;  %v675_v51 = vmul.f32 %v1428_v47, %v1652_v34  ;;  %v509_v53 = vpop.f32.mrb[3].mxu1 }
  0xdd   :  { %v711_v50 = vadd.f32 %v1657_v36, %v640_v41  ;;  %v641_v52 = vmul.f32 %v1652_v34, %v381_v48  ;;  %v743_v55 = vadd.f32 %v1657_v36, %v672_v45  ;;  %v673_v57 = vmul.f32 %v1652_v34, %v509_v53 }
  0xde   :  { %v777_v54 = vmax.f32 %v713_v44, 0.0  ;;  %v714_v56 = vadd.f32 %v1657_v36, %v643_v46  ;;  %v809_v58 = vmax.f32 %v745_v49, 0.0  ;;  %v746_v60 = vadd.f32 %v1657_v36, %v675_v51 }
  0xdf   :  { %v775_v59 = vmax.f32 %v711_v50, 0.0  ;;  %v712_v61 = vadd.f32 %v1657_v36, %v641_v52  ;;  %v807_v63 = vmax.f32 %v743_v55, 0.0  ;;  %v744_v1 = vadd.f32 %v1657_v36, %v673_v57 }
  0xe0   :  { %v1296_v62 = vpack.c.bf16 %v777_v54, %v777_v54  ;;  %v778_v0 = vmax.f32 %v714_v56, 0.0  ;;  %v1328_v2 = vpack.c.bf16 %v809_v58, %v809_v58  ;;  %v810_v4 = vmax.f32 %v746_v60, 0.0 }
  0xe1   :  { %v1294_v3 = vpack.c.bf16 %v775_v59, %v775_v59  ;;  %v776_v5 = vmax.f32 %v712_v61, 0.0  ;;  %v1399_v6 = vpop.f32.mrb[4].mxu0  ;;  %v1326_v7 = vpack.c.bf16 %v807_v63, %v807_v63  ;;  %v808_v9 = vmax.f32 %v744_v1, 0.0  ;;  %v1431_v11 = vpop.f32.mrb[4].mxu1 }
  0xe2   :  { %1098 = vst.msk [vmem:[%s2047_s4 + $0x8] sm:$0xf] %vm1095_vm2, %v1296_v62  ;;  %v1297_v8 = vpack.c.bf16 %v778_v0, %v778_v0  ;;  %v646_v10 = vmul.f32 %v1399_v6, %v1652_v34  ;;  %v394_v12 = vpop.f32.mrb[5].mxu0  ;;  %1130 = vst.msk [vmem:[%s2047_s4 + $0x88] sm:$0xf] %vm1095_vm2, %v1328_v2  ;;  %v1329_v13 = vpack.c.bf16 %v810_v4, %v810_v4  ;;  %v522_v17 = vpop.f32.mrb[5].mxu1 }
  0xe3   :  { %1096 = vst.msk [vmem:[%s2047_s4] sm:$0xf] %vm1095_vm2, %v1294_v3  ;;  %v1295_v14 = vpack.c.bf16 %v776_v5, %v776_v5  ;;  %v678_v15 = vmul.f32 %v1431_v11, %v1652_v34  ;;  %v644_v16 = vmul.f32 %v1652_v34, %v394_v12  ;;  %v1400_v18 = vpop.f32.mrb[6].mxu0  ;;  %1128 = vst.msk [vmem:[%s2047_s4 + $0x80] sm:$0xf] %vm1095_vm2, %v1326_v7  ;;  %v1432_v23 = vpop.f32.mrb[6].mxu1 }
  0xe4   :  { %1099 = vst.msk [vmem:[%s2047_s4 + $0xc] sm:$0xf] %vm1095_vm2, %v1297_v8  ;;  %v1327_v19 = vpack.c.bf16 %v808_v9, %v808_v9  ;;  %v717_v20 = vadd.f32 %v1657_v36, %v646_v10  ;;  %v676_v21 = vmul.f32 %v1652_v34, %v522_v17  ;;  %v647_v22 = vmul.f32 %v1400_v18, %v1652_v34  ;;  %v397_v24 = vpop.f32.mrb[7].mxu0  ;;  %v525_v29 = vpop.f32.mrb[7].mxu1 }
  0xe5   :  { %1131 = vst.msk [vmem:[%s2047_s4 + $0x8c] sm:$0xf] %vm1095_vm2, %v1329_v13  ;;  %1097 = vst.msk [vmem:[%s2047_s4 + $0x4] sm:$0xf] %vm1095_vm2, %v1295_v14  ;;  %v749_v25 = vadd.f32 %v1657_v36, %v678_v15  ;;  %v715_v26 = vadd.f32 %v1657_v36, %v644_v16  ;;  %v679_v27 = vmul.f32 %v1432_v23, %v1652_v34 }
  0xe6   :  { %v645_v28 = vmul.f32 %v1652_v34, %v397_v24  ;;  %1129 = vst.msk [vmem:[%s2047_s4 + $0x84] sm:$0xf] %vm1095_vm2, %v1327_v19  ;;  %v781_v30 = vmax.f32 %v717_v20, 0.0  ;;  %v747_v31 = vadd.f32 %v1657_v36, %v676_v21  ;;  %v718_v32 = vadd.f32 %v1657_v36, %v647_v22 }
  0xe7   :  { %v677_v33 = vmul.f32 %v1652_v34, %v525_v29  ;;  %v813_v35 = vmax.f32 %v749_v25, 0.0  ;;  %v779_v37 = vmax.f32 %v715_v26, 0.0  ;;  %v750_v38 = vadd.f32 %v1657_v36, %v679_v27 }
  0xe8   :  { %v716_v39 = vadd.f32 %v1657_v36, %v645_v28  ;;  %v1300_v40 = vpack.c.bf16 %v781_v30, %v781_v30  ;;  %v811_v41 = vmax.f32 %v747_v31, 0.0  ;;  %v782_v42 = vmax.f32 %v718_v32, 0.0 }
  0xe9   :  { %v748_v43 = vadd.f32 %v1657_v36, %v677_v33  ;;  %v1332_v44 = vpack.c.bf16 %v813_v35, %v813_v35  ;;  %v1298_v45 = vpack.c.bf16 %v779_v37, %v779_v37  ;;  %v814_v46 = vmax.f32 %v750_v38, 0.0  ;;  %v1403_v48 = vpop.f32.mrb[8].mxu0  ;;  %v1435_v53 = vpop.f32.mrb[8].mxu1 }
  0xea   :  { %v780_v47 = vmax.f32 %v716_v39, 0.0  ;;  %1102 = vst.msk [vmem:[%s2047_s4 + $0x18] sm:$0xf] %vm1095_vm2, %v1300_v40  ;;  %v1330_v49 = vpack.c.bf16 %v811_v41, %v811_v41  ;;  %v1301_v50 = vpack.c.bf16 %v782_v42, %v782_v42  ;;  %v650_v52 = vmul.f32 %v1403_v48, %v1652_v34  ;;  %v410_v54 = vpop.f32.mrb[9].mxu0  ;;  %v538_v59 = vpop.f32.mrb[9].mxu1 }
  0xeb   :  { %v812_v51 = vmax.f32 %v748_v43, 0.0  ;;  %1134 = vst.msk [vmem:[%s2047_s4 + $0x98] sm:$0xf] %vm1095_vm2, %v1332_v44  ;;  %1100 = vst.msk [vmem:[%s2047_s4 + $0x10] sm:$0xf] %vm1095_vm2, %v1298_v45  ;;  %v1333_v55 = vpack.c.bf16 %v814_v46, %v814_v46  ;;  %v682_v57 = vmul.f32 %v1435_v53, %v1652_v34  ;;  %v648_v58 = vmul.f32 %v1652_v34, %v410_v54  ;;  %v1404_v60 = vpop.f32.mrb[10].mxu0 }
  0xec   :  { %v1299_v56 = vpack.c.bf16 %v780_v47, %v780_v47  ;;  %1132 = vst.msk [vmem:[%s2047_s4 + $0x90] sm:$0xf] %vm1095_vm2, %v1330_v49  ;;  %1103 = vst.msk [vmem:[%s2047_s4 + $0x1c] sm:$0xf] %vm1095_vm2, %v1301_v50  ;;  %v721_v62 = vadd.f32 %v1657_v36, %v650_v52  ;;  %v680_v63 = vmul.f32 %v1652_v34, %v538_v59  ;;  %v1436_v1 = vpop.f32.mrb[10].mxu1  ;;  %v413_v2 = vpop.f32.mrb[11].mxu0 }
  0xed   :  { %v1331_v61 = vpack.c.bf16 %v812_v51, %v812_v51  ;;  %v651_v0 = vmul.f32 %v1404_v60, %v1652_v34  ;;  %1135 = vst.msk [vmem:[%s2047_s4 + $0x9c] sm:$0xf] %vm1095_vm2, %v1333_v55  ;;  %v753_v3 = vadd.f32 %v1657_v36, %v682_v57  ;;  %v719_v4 = vadd.f32 %v1657_v36, %v648_v58  ;;  %v541_v7 = vpop.f32.mrb[11].mxu1 }
  0xee   :  { %1101 = vst.msk [vmem:[%s2047_s4 + $0x14] sm:$0xf] %vm1095_vm2, %v1299_v56  ;;  %v683_v5 = vmul.f32 %v1436_v1, %v1652_v34  ;;  %v649_v6 = vmul.f32 %v1652_v34, %v413_v2  ;;  %v785_v8 = vmax.f32 %v721_v62, 0.0  ;;  %v751_v9 = vadd.f32 %v1657_v36, %v680_v63 }
  0xef   :  { %1133 = vst.msk [vmem:[%s2047_s4 + $0x94] sm:$0xf] %vm1095_vm2, %v1331_v61  ;;  %v722_v10 = vadd.f32 %v1657_v36, %v651_v0  ;;  %v681_v11 = vmul.f32 %v1652_v34, %v541_v7  ;;  %v817_v12 = vmax.f32 %v753_v3, 0.0  ;;  %v783_v13 = vmax.f32 %v719_v4, 0.0 }
  0xf0   :  { %v754_v14 = vadd.f32 %v1657_v36, %v683_v5  ;;  %v720_v15 = vadd.f32 %v1657_v36, %v649_v6  ;;  %v1304_v16 = vpack.c.bf16 %v785_v8, %v785_v8  ;;  %v815_v17 = vmax.f32 %v751_v9, 0.0 }
  0xf1   :  { %v786_v18 = vmax.f32 %v722_v10, 0.0  ;;  %v752_v19 = vadd.f32 %v1657_v36, %v681_v11  ;;  %v1336_v20 = vpack.c.bf16 %v817_v12, %v817_v12  ;;  %v1302_v21 = vpack.c.bf16 %v783_v13, %v783_v13  ;;  %v1407_v24 = vpop.f32.mrb[12].mxu0  ;;  %v1439_v29 = vpop.f32.mrb[12].mxu1 }
  0xf2   :  { %v818_v22 = vmax.f32 %v754_v14, 0.0  ;;  %v784_v23 = vmax.f32 %v720_v15, 0.0  ;;  %1106 = vst.msk [vmem:[%s2047_s4 + $0x28] sm:$0xf] %vm1095_vm2, %v1304_v16  ;;  %v1334_v25 = vpack.c.bf16 %v815_v17, %v815_v17  ;;  %v654_v28 = vmul.f32 %v1407_v24, %v1652_v34  ;;  %v426_v30 = vpop.f32.mrb[13].mxu0  ;;  %v554_v37 = vpop.f32.mrb[13].mxu1 }
  0xf3   :  { %v1305_v26 = vpack.c.bf16 %v786_v18, %v786_v18  ;;  %v816_v27 = vmax.f32 %v752_v19, 0.0  ;;  %1138 = vst.msk [vmem:[%s2047_s4 + $0xa8] sm:$0xf] %vm1095_vm2, %v1336_v20  ;;  %1104 = vst.msk [vmem:[%s2047_s4 + $0x20] sm:$0xf] %vm1095_vm2, %v1302_v21  ;;  %v686_v33 = vmul.f32 %v1439_v29, %v1652_v34  ;;  %v652_v35 = vmul.f32 %v1652_v34, %v426_v30  ;;  %v1408_v38 = vpop.f32.mrb[14].mxu0 }
  0xf4   :  { %v1337_v31 = vpack.c.bf16 %v818_v22, %v818_v22  ;;  %v1303_v32 = vpack.c.bf16 %v784_v23, %v784_v23  ;;  %1136 = vst.msk [vmem:[%s2047_s4 + $0xa0] sm:$0xf] %vm1095_vm2, %v1334_v25  ;;  %v725_v40 = vadd.f32 %v1657_v36, %v654_v28  ;;  %v684_v41 = vmul.f32 %v1652_v34, %v554_v37  ;;  %v1440_v43 = vpop.f32.mrb[14].mxu1  ;;  %v429_v44 = vpop.f32.mrb[15].mxu0 }
  0xf5   :  { %1107 = vst.msk [vmem:[%s2047_s4 + $0x2c] sm:$0xf] %vm1095_vm2, %v1305_v26  ;;  %v1335_v39 = vpack.c.bf16 %v816_v27, %v816_v27  ;;  %v655_v42 = vmul.f32 %v1408_v38, %v1652_v34  ;;  %v757_v45 = vadd.f32 %v1657_v36, %v686_v33  ;;  %v723_v46 = vadd.f32 %v1657_v36, %v652_v35  ;;  %v557_v49 = vpop.f32.mrb[15].mxu1 }
  0xf6   :  { %1139 = vst.msk [vmem:[%s2047_s4 + $0xac] sm:$0xf] %vm1095_vm2, %v1337_v31  ;;  %1105 = vst.msk [vmem:[%s2047_s4 + $0x24] sm:$0xf] %vm1095_vm2, %v1303_v32  ;;  %v687_v47 = vmul.f32 %v1440_v43, %v1652_v34  ;;  %v653_v48 = vmul.f32 %v1652_v34, %v429_v44  ;;  %v789_v50 = vmax.f32 %v725_v40, 0.0  ;;  %v755_v51 = vadd.f32 %v1657_v36, %v684_v41 }
  0xf7   :  { %1137 = vst.msk [vmem:[%s2047_s4 + $0xa4] sm:$0xf] %vm1095_vm2, %v1335_v39  ;;  %v726_v52 = vadd.f32 %v1657_v36, %v655_v42  ;;  %v685_v53 = vmul.f32 %v1652_v34, %v557_v49  ;;  %v821_v54 = vmax.f32 %v757_v45, 0.0  ;;  %v787_v55 = vmax.f32 %v723_v46, 0.0 }
  0xf8   :  { %v758_v56 = vadd.f32 %v1657_v36, %v687_v47  ;;  %v724_v57 = vadd.f32 %v1657_v36, %v653_v48  ;;  %v1308_v58 = vpack.c.bf16 %v789_v50, %v789_v50  ;;  %v819_v59 = vmax.f32 %v755_v51, 0.0 }
  0xf9   :  { %v790_v60 = vmax.f32 %v726_v52, 0.0  ;;  %v756_v61 = vadd.f32 %v1657_v36, %v685_v53  ;;  %v1340_v62 = vpack.c.bf16 %v821_v54, %v821_v54  ;;  %v1306_v63 = vpack.c.bf16 %v787_v55, %v787_v55  ;;  %v1411_v2 = vpop.f32.mrb[16].mxu0  ;;  %v1443_v7 = vpop.f32.mrb[16].mxu1 }
  0xfa   :  { %v822_v0 = vmax.f32 %v758_v56, 0.0  ;;  %v788_v1 = vmax.f32 %v724_v57, 0.0  ;;  %1110 = vst.msk [vmem:[%s2047_s4 + $0x38] sm:$0xf] %vm1095_vm2, %v1308_v58  ;;  %v1338_v3 = vpack.c.bf16 %v819_v59, %v819_v59  ;;  %v658_v6 = vmul.f32 %v1411_v2, %v1652_v34  ;;  %v442_v8 = vpop.f32.mrb[17].mxu0  ;;  %v570_v13 = vpop.f32.mrb[17].mxu1 }
  0xfb   :  { %v1309_v4 = vpack.c.bf16 %v790_v60, %v790_v60  ;;  %v820_v5 = vmax.f32 %v756_v61, 0.0  ;;  %1142 = vst.msk [vmem:[%s2047_s4 + $0xb8] sm:$0xf] %vm1095_vm2, %v1340_v62  ;;  %1108 = vst.msk [vmem:[%s2047_s4 + $0x30] sm:$0xf] %vm1095_vm2, %v1306_v63  ;;  %v690_v11 = vmul.f32 %v1443_v7, %v1652_v34  ;;  %v656_v12 = vmul.f32 %v1652_v34, %v442_v8  ;;  %v1412_v14 = vpop.f32.mrb[18].mxu0 }
  0xfc   :  { %v1341_v9 = vpack.c.bf16 %v822_v0, %v822_v0  ;;  %v1307_v10 = vpack.c.bf16 %v788_v1, %v788_v1  ;;  %1140 = vst.msk [vmem:[%s2047_s4 + $0xb0] sm:$0xf] %vm1095_vm2, %v1338_v3  ;;  %v729_v16 = vadd.f32 %v1657_v36, %v658_v6  ;;  %v688_v17 = vmul.f32 %v1652_v34, %v570_v13  ;;  %v1444_v19 = vpop.f32.mrb[18].mxu1  ;;  %v445_v20 = vpop.f32.mrb[19].mxu0 }
  0xfd   :  { %1111 = vst.msk [vmem:[%s2047_s4 + $0x3c] sm:$0xf] %vm1095_vm2, %v1309_v4  ;;  %v1339_v15 = vpack.c.bf16 %v820_v5, %v820_v5  ;;  %v659_v18 = vmul.f32 %v1412_v14, %v1652_v34  ;;  %v761_v21 = vadd.f32 %v1657_v36, %v690_v11  ;;  %v727_v22 = vadd.f32 %v1657_v36, %v656_v12  ;;  %v573_v25 = vpop.f32.mrb[19].mxu1 }
  0xfe   :  { %1143 = vst.msk [vmem:[%s2047_s4 + $0xbc] sm:$0xf] %vm1095_vm2, %v1341_v9  ;;  %1109 = vst.msk [vmem:[%s2047_s4 + $0x34] sm:$0xf] %vm1095_vm2, %v1307_v10  ;;  %v691_v23 = vmul.f32 %v1444_v19, %v1652_v34  ;;  %v657_v24 = vmul.f32 %v1652_v34, %v445_v20  ;;  %v793_v26 = vmax.f32 %v729_v16, 0.0  ;;  %v759_v27 = vadd.f32 %v1657_v36, %v688_v17 }
  0xff   :  { %1141 = vst.msk [vmem:[%s2047_s4 + $0xb4] sm:$0xf] %vm1095_vm2, %v1339_v15  ;;  %v730_v28 = vadd.f32 %v1657_v36, %v659_v18  ;;  %v689_v29 = vmul.f32 %v1652_v34, %v573_v25  ;;  %v825_v30 = vmax.f32 %v761_v21, 0.0  ;;  %v791_v31 = vmax.f32 %v727_v22, 0.0 }
 0x100   :  { %v762_v32 = vadd.f32 %v1657_v36, %v691_v23  ;;  %v728_v33 = vadd.f32 %v1657_v36, %v657_v24  ;;  %v1312_v35 = vpack.c.bf16 %v793_v26, %v793_v26  ;;  %v823_v37 = vmax.f32 %v759_v27, 0.0 }
 0x101   :  { %v794_v38 = vmax.f32 %v730_v28, 0.0  ;;  %v760_v39 = vadd.f32 %v1657_v36, %v689_v29  ;;  %v1344_v40 = vpack.c.bf16 %v825_v30, %v825_v30  ;;  %v1310_v41 = vpack.c.bf16 %v791_v31, %v791_v31  ;;  %v1415_v44 = vpop.f32.mrb[20].mxu0  ;;  %v1447_v49 = vpop.f32.mrb[20].mxu1 }
 0x102   :  { %v826_v42 = vmax.f32 %v762_v32, 0.0  ;;  %v792_v43 = vmax.f32 %v728_v33, 0.0  ;;  %1114 = vst.msk [vmem:[%s2047_s4 + $0x48] sm:$0xf] %vm1095_vm2, %v1312_v35  ;;  %v1342_v45 = vpack.c.bf16 %v823_v37, %v823_v37  ;;  %v662_v48 = vmul.f32 %v1415_v44, %v1652_v34  ;;  %v458_v50 = vpop.f32.mrb[21].mxu0  ;;  %v586_v55 = vpop.f32.mrb[21].mxu1 }
 0x103   :  { %v1313_v46 = vpack.c.bf16 %v794_v38, %v794_v38  ;;  %v824_v47 = vmax.f32 %v760_v39, 0.0  ;;  %1146 = vst.msk [vmem:[%s2047_s4 + $0xc8] sm:$0xf] %vm1095_vm2, %v1344_v40  ;;  %1112 = vst.msk [vmem:[%s2047_s4 + $0x40] sm:$0xf] %vm1095_vm2, %v1310_v41  ;;  %v694_v53 = vmul.f32 %v1447_v49, %v1652_v34  ;;  %v660_v54 = vmul.f32 %v1652_v34, %v458_v50  ;;  %v1416_v56 = vpop.f32.mrb[22].mxu0 }
 0x104   :  { %v1345_v51 = vpack.c.bf16 %v826_v42, %v826_v42  ;;  %v1311_v52 = vpack.c.bf16 %v792_v43, %v792_v43  ;;  %1144 = vst.msk [vmem:[%s2047_s4 + $0xc0] sm:$0xf] %vm1095_vm2, %v1342_v45  ;;  %v733_v58 = vadd.f32 %v1657_v36, %v662_v48  ;;  %v692_v59 = vmul.f32 %v1652_v34, %v586_v55  ;;  %v1448_v61 = vpop.f32.mrb[22].mxu1  ;;  %v461_v62 = vpop.f32.mrb[23].mxu0 }
 0x105   :  { %1115 = vst.msk [vmem:[%s2047_s4 + $0x4c] sm:$0xf] %vm1095_vm2, %v1313_v46  ;;  %v1343_v57 = vpack.c.bf16 %v824_v47, %v824_v47  ;;  %v663_v60 = vmul.f32 %v1416_v56, %v1652_v34  ;;  %v765_v63 = vadd.f32 %v1657_v36, %v694_v53  ;;  %v731_v0 = vadd.f32 %v1657_v36, %v660_v54  ;;  %v589_v3 = vpop.f32.mrb[23].mxu1 }
 0x106   :  { %1147 = vst.msk [vmem:[%s2047_s4 + $0xcc] sm:$0xf] %vm1095_vm2, %v1345_v51  ;;  %1113 = vst.msk [vmem:[%s2047_s4 + $0x44] sm:$0xf] %vm1095_vm2, %v1311_v52  ;;  %v695_v1 = vmul.f32 %v1448_v61, %v1652_v34  ;;  %v661_v2 = vmul.f32 %v1652_v34, %v461_v62  ;;  %v797_v4 = vmax.f32 %v733_v58, 0.0  ;;  %v763_v5 = vadd.f32 %v1657_v36, %v692_v59 }
 0x107   :  { %1145 = vst.msk [vmem:[%s2047_s4 + $0xc4] sm:$0xf] %vm1095_vm2, %v1343_v57  ;;  %v734_v6 = vadd.f32 %v1657_v36, %v663_v60  ;;  %v693_v7 = vmul.f32 %v1652_v34, %v589_v3  ;;  %v829_v8 = vmax.f32 %v765_v63, 0.0  ;;  %v795_v9 = vmax.f32 %v731_v0, 0.0 }
 0x108   :  { %v766_v10 = vadd.f32 %v1657_v36, %v695_v1  ;;  %v732_v11 = vadd.f32 %v1657_v36, %v661_v2  ;;  %v1316_v12 = vpack.c.bf16 %v797_v4, %v797_v4  ;;  %v827_v13 = vmax.f32 %v763_v5, 0.0 }
 0x109   :  { %v798_v14 = vmax.f32 %v734_v6, 0.0  ;;  %v764_v15 = vadd.f32 %v1657_v36, %v693_v7  ;;  %v1348_v16 = vpack.c.bf16 %v829_v8, %v829_v8  ;;  %v1314_v17 = vpack.c.bf16 %v795_v9, %v795_v9  ;;  %v1419_v20 = vpop.f32.mrb[24].mxu0  ;;  %v1451_v25 = vpop.f32.mrb[24].mxu1 }
 0x10a   :  { %v830_v18 = vmax.f32 %v766_v10, 0.0  ;;  %v796_v19 = vmax.f32 %v732_v11, 0.0  ;;  %1118 = vst.msk [vmem:[%s2047_s4 + $0x58] sm:$0xf] %vm1095_vm2, %v1316_v12  ;;  %v1346_v21 = vpack.c.bf16 %v827_v13, %v827_v13  ;;  %v666_v24 = vmul.f32 %v1419_v20, %v1652_v34  ;;  %v474_v26 = vpop.f32.mrb[25].mxu0  ;;  %v602_v31 = vpop.f32.mrb[25].mxu1 }
 0x10b   :  { %v1317_v22 = vpack.c.bf16 %v798_v14, %v798_v14  ;;  %v828_v23 = vmax.f32 %v764_v15, 0.0  ;;  %1150 = vst.msk [vmem:[%s2047_s4 + $0xd8] sm:$0xf] %vm1095_vm2, %v1348_v16  ;;  %1116 = vst.msk [vmem:[%s2047_s4 + $0x50] sm:$0xf] %vm1095_vm2, %v1314_v17  ;;  %v698_v29 = vmul.f32 %v1451_v25, %v1652_v34  ;;  %v664_v30 = vmul.f32 %v1652_v34, %v474_v26  ;;  %v1420_v32 = vpop.f32.mrb[26].mxu0 }
 0x10c   :  { %v1349_v27 = vpack.c.bf16 %v830_v18, %v830_v18  ;;  %v1315_v28 = vpack.c.bf16 %v796_v19, %v796_v19  ;;  %1148 = vst.msk [vmem:[%s2047_s4 + $0xd0] sm:$0xf] %vm1095_vm2, %v1346_v21  ;;  %v737_v35 = vadd.f32 %v1657_v36, %v666_v24  ;;  %v696_v37 = vmul.f32 %v1652_v34, %v602_v31  ;;  %v1452_v39 = vpop.f32.mrb[26].mxu1  ;;  %v477_v40 = vpop.f32.mrb[27].mxu0 }
 0x10d   :  { %1119 = vst.msk [vmem:[%s2047_s4 + $0x5c] sm:$0xf] %vm1095_vm2, %v1317_v22  ;;  %v1347_v33 = vpack.c.bf16 %v828_v23, %v828_v23  ;;  %v667_v38 = vmul.f32 %v1420_v32, %v1652_v34  ;;  %v769_v41 = vadd.f32 %v1657_v36, %v698_v29  ;;  %v735_v42 = vadd.f32 %v1657_v36, %v664_v30  ;;  %v605_v45 = vpop.f32.mrb[27].mxu1 }
 0x10e   :  { %1151 = vst.msk [vmem:[%s2047_s4 + $0xdc] sm:$0xf] %vm1095_vm2, %v1349_v27  ;;  %1117 = vst.msk [vmem:[%s2047_s4 + $0x54] sm:$0xf] %vm1095_vm2, %v1315_v28  ;;  %v699_v43 = vmul.f32 %v1452_v39, %v1652_v34  ;;  %v665_v44 = vmul.f32 %v1652_v34, %v477_v40  ;;  %v801_v46 = vmax.f32 %v737_v35, 0.0  ;;  %v767_v47 = vadd.f32 %v1657_v36, %v696_v37 }
 0x10f   :  { %1149 = vst.msk [vmem:[%s2047_s4 + $0xd4] sm:$0xf] %vm1095_vm2, %v1347_v33  ;;  %v738_v48 = vadd.f32 %v1657_v36, %v667_v38  ;;  %v697_v49 = vmul.f32 %v1652_v34, %v605_v45  ;;  %v833_v50 = vmax.f32 %v769_v41, 0.0  ;;  %v799_v51 = vmax.f32 %v735_v42, 0.0 }
 0x110   :  { %v770_v52 = vadd.f32 %v1657_v36, %v699_v43  ;;  %v736_v53 = vadd.f32 %v1657_v36, %v665_v44  ;;  %v1320_v54 = vpack.c.bf16 %v801_v46, %v801_v46  ;;  %v831_v55 = vmax.f32 %v767_v47, 0.0 }
 0x111   :  { %v802_v56 = vmax.f32 %v738_v48, 0.0  ;;  %v768_v57 = vadd.f32 %v1657_v36, %v697_v49  ;;  %v1352_v58 = vpack.c.bf16 %v833_v50, %v833_v50  ;;  %v1318_v59 = vpack.c.bf16 %v799_v51, %v799_v51  ;;  %v1423_v62 = vpop.f32.mrb[28].mxu0  ;;  %v1455_v3 = vpop.f32.mrb[28].mxu1 }
 0x112   :  { %v834_v60 = vmax.f32 %v770_v52, 0.0  ;;  %v800_v61 = vmax.f32 %v736_v53, 0.0  ;;  %1122 = vst.msk [vmem:[%s2047_s4 + $0x68] sm:$0xf] %vm1095_vm2, %v1320_v54  ;;  %v1350_v63 = vpack.c.bf16 %v831_v55, %v831_v55  ;;  %v670_v2 = vmul.f32 %v1423_v62, %v1652_v34  ;;  %v490_v4 = vpop.f32.mrb[29].mxu0  ;;  %v618_v9 = vpop.f32.mrb[29].mxu1 }
 0x113   :  { %v1321_v0 = vpack.c.bf16 %v802_v56, %v802_v56  ;;  %v832_v1 = vmax.f32 %v768_v57, 0.0  ;;  %1154 = vst.msk [vmem:[%s2047_s4 + $0xe8] sm:$0xf] %vm1095_vm2, %v1352_v58  ;;  %1120 = vst.msk [vmem:[%s2047_s4 + $0x60] sm:$0xf] %vm1095_vm2, %v1318_v59  ;;  %v702_v7 = vmul.f32 %v1455_v3, %v1652_v34  ;;  %v668_v8 = vmul.f32 %v1652_v34, %v490_v4  ;;  %v1424_v10 = vpop.f32.mrb[30].mxu0 }
 0x114   :  { %v1353_v5 = vpack.c.bf16 %v834_v60, %v834_v60  ;;  %v1319_v6 = vpack.c.bf16 %v800_v61, %v800_v61  ;;  %1152 = vst.msk [vmem:[%s2047_s4 + $0xe0] sm:$0xf] %vm1095_vm2, %v1350_v63  ;;  %v741_v12 = vadd.f32 %v1657_v36, %v670_v2  ;;  %v700_v13 = vmul.f32 %v1652_v34, %v618_v9  ;;  %v1456_v15 = vpop.f32.mrb[30].mxu1  ;;  %v493_v16 = vpop.f32.mrb[31].mxu0 }
 0x115   :  { %1123 = vst.msk [vmem:[%s2047_s4 + $0x6c] sm:$0xf] %vm1095_vm2, %v1321_v0  ;;  %v1351_v11 = vpack.c.bf16 %v832_v1, %v832_v1  ;;  %v671_v14 = vmul.f32 %v1424_v10, %v1652_v34  ;;  %v773_v17 = vadd.f32 %v1657_v36, %v702_v7  ;;  %v739_v18 = vadd.f32 %v1657_v36, %v668_v8  ;;  %v621_v21 = vpop.f32.mrb[31].mxu1 }
 0x116   :  { %1155 = vst.msk [vmem:[%s2047_s4 + $0xec] sm:$0xf] %vm1095_vm2, %v1353_v5  ;;  %1121 = vst.msk [vmem:[%s2047_s4 + $0x64] sm:$0xf] %vm1095_vm2, %v1319_v6  ;;  %v703_v19 = vmul.f32 %v1456_v15, %v1652_v34  ;;  %v669_v20 = vmul.f32 %v1652_v34, %v493_v16  ;;  %v805_v22 = vmax.f32 %v741_v12, 0.0  ;;  %v771_v23 = vadd.f32 %v1657_v36, %v700_v13 }
 0x117   :  { %1153 = vst.msk [vmem:[%s2047_s4 + $0xe4] sm:$0xf] %vm1095_vm2, %v1351_v11  ;;  %v742_v24 = vadd.f32 %v1657_v36, %v671_v14  ;;  %v701_v25 = vmul.f32 %v1652_v34, %v621_v21  ;;  %v837_v26 = vmax.f32 %v773_v17, 0.0  ;;  %v803_v27 = vmax.f32 %v739_v18, 0.0 }
 0x118   :  { %v774_v28 = vadd.f32 %v1657_v36, %v703_v19  ;;  %v740_v29 = vadd.f32 %v1657_v36, %v669_v20  ;;  %v1324_v30 = vpack.c.bf16 %v805_v22, %v805_v22  ;;  %v835_v31 = vmax.f32 %v771_v23, 0.0 }
 0x119   :  { %v806_v32 = vmax.f32 %v742_v24, 0.0  ;;  %v772_v33 = vadd.f32 %v1657_v36, %v701_v25  ;;  %v1356_v35 = vpack.c.bf16 %v837_v26, %v837_v26  ;;  %v1322_v37 = vpack.c.bf16 %v803_v27, %v803_v27 }
 0x11a   :  { %v838_v38 = vmax.f32 %v774_v28, 0.0  ;;  %v804_v39 = vmax.f32 %v740_v29, 0.0  ;;  %1126 = vst.msk [vmem:[%s2047_s4 + $0x78] sm:$0xf] %vm1095_vm2, %v1324_v30  ;;  %v1354_v34 = vpack.c.bf16 %v835_v31, %v835_v31 }
 0x11b   :  { %v1325_v40 = vpack.c.bf16 %v806_v32, %v806_v32  ;;  %v836_v41 = vmax.f32 %v772_v33, 0.0  ;;  %1158 = vst.msk [vmem:[%s2047_s4 + $0xf8] sm:$0xf] %vm1095_vm2, %v1356_v35  ;;  %1124 = vst.msk [vmem:[%s2047_s4 + $0x70] sm:$0xf] %vm1095_vm2, %v1322_v37 }
 0x11c   :  { %v1357_v36 = vpack.c.bf16 %v838_v38, %v838_v38  ;;  %v1323_v42 = vpack.c.bf16 %v804_v39, %v804_v39  ;;  %1156 = vst.msk [vmem:[%s2047_s4 + $0xf0] sm:$0xf] %vm1095_vm2, %v1354_v34 }
 0x11d   :  { %1127 = vst.msk [vmem:[%s2047_s4 + $0x7c] sm:$0xf] %vm1095_vm2, %v1325_v40  ;;  %v1355_v43 = vpack.c.bf16 %v836_v41, %v836_v41 }
 0x11e   :  { %1159 = vst.msk [vmem:[%s2047_s4 + $0xfc] sm:$0xf] %vm1095_vm2, %v1357_v36  ;;  %1125 = vst.msk [vmem:[%s2047_s4 + $0x74] sm:$0xf] %vm1095_vm2, %v1323_v42 }
 0x11f   :  { %1157 = vst.msk [vmem:[%s2047_s4 + $0xf4] sm:$0xf] %vm1095_vm2, %v1355_v43 }

</bundles_post_ra>
